<compile_context>
chip_gen: v6e
topology: v6e:2x2x1
jax: 0.10.0
libtpu: 0.0.40
codegen_flags: <defaults>
</compile_context>

<pallas_src>
import math

import jax
import jax.numpy as jnp
from jax.experimental import pallas as pl
from jax.experimental.pallas import tpu as pltpu


def _affine_kernel(alpha_ref, beta_ref, x_ref, o_ref):
    # alpha_ref / beta_ref: (1, Dp) resident tiles; x_ref / o_ref: (tm, Dp).
    # The (1, Dp) operands broadcast over the tm rows on the VPU.
    o_ref[...] = alpha_ref[...] * x_ref[...] + beta_ref[...]


def _device_profile():
    """Returns (multi_tensorcore, default_row_tile_bytes) for the local TPU."""
    try:
        kind = jax.devices()[0].device_kind.lower()
    except Exception:  # pragma: no cover - defensive
        return False, 2 << 20
    if "v7" in kind:
        # v7x: ~2.2-2.5x faster HBM per TC -> bigger tiles amortize the
        # ~0.35 us per-grid-step overhead; 2 TCs -> shard the row axis.
        return True, 6 << 20
    if "v4" in kind or "v5p" in kind:
        # Megacore chips: shard across cores, default tile is fine.
        return True, 2 << 20
    # v5e / v6e: single TensorCore, 1-2 MiB tiles already ~85% of roofline.
    return False, 2 << 20


def affine_transform(x, alpha, beta, *, row_tile_bytes=None,
                     min_pallas_elements=1 << 18, donate_x=False):
    """y = alpha * x + beta with alpha/beta of shape (1, 1, D), x of shape (B, N, D)."""
    B, N, D = x.shape
    M = B * N

    # Tiny inputs: pallas_call fixed cost dwarfs the work; let XLA fuse the
    # affine into its producer/consumer instead (bigger win than any kernel).
    if M * D < min_pallas_elements:
        return alpha * x + beta

    multi_core, default_tile_bytes = _device_profile()
    if row_tile_bytes is None:
        row_tile_bytes = default_tile_bytes

    itemsize = jnp.dtype(x.dtype).itemsize
    # Sublane packing of the second-minor dim: 8 rows per vreg for 32-bit,
    # 16 for 16-bit, 32 for 8-bit dtypes.
    sub = {8: 8, 4: 8, 2: 16, 1: 32}.get(itemsize, 8)

    # --- Lane-dense repack: fold `rep` consecutive rows together so the minor
    # (lane) dim is a multiple of 128 -> unmasked vector stores.  Generalized
    # to any D via Dp = lcm(D, 128), capped so tiles stay reasonable.
    dp_target = (D * 128) // math.gcd(D, 128)  # lcm(D, 128)
    rep = dp_target // D
    if rep > 1 and dp_target <= 1024 and M % rep == 0:
        Mp, Dp = M // rep, dp_target
    else:
        Mp, Dp = M, D
        rep = 1

    x2 = x.reshape(Mp, Dp)
    a2 = jnp.tile(alpha.reshape(1, D), (1, rep))
    b2 = jnp.tile(beta.reshape(1, D), (1, rep))

    # --- Row tile: as big as the per-tile byte budget allows (amortizes
    # per-grid-step overhead), aligned to the dtype's sublane packing.
    tm_cap = max(sub, row_tile_bytes // max(1, Dp * itemsize))
    tm = min(tm_cap, Mp)
    if tm >= sub:
        tm = (tm // sub) * sub
    else:
        tm = Mp  # full-extent block satisfies the (8, 128) rule

    # On multi-TensorCore chips, aim for an even number (>= 4) of grid steps
    # so both cores are balanced and the double-buffer pipeline overlaps DMA.
    # Single-TC chips skip this: splitting only adds per-step overhead.
    if multi_core and tm >= sub and Mp >= 4 * sub:
        grid_m = pl.cdiv(Mp, tm)
        if grid_m < 4 or grid_m % 2:
            target = max(4, grid_m + (grid_m % 2))
            cand = -(-Mp // target)                       # ceil(Mp / target)
            cand = max(sub, ((cand + sub - 1) // sub) * sub)
            if pl.cdiv(Mp, cand) % 2 == 0:
                tm = min(tm, cand)

    grid_m = pl.cdiv(Mp, tm)   # ragged last block is masked by Pallas; no pad.

    # VMEM budget: double-buffered x + out tiles, sublane-padded alpha/beta,
    # plus Mosaic internal scratch -> 6 tiles + 2 MiB margin, capped at 48 MiB.
    tile_bytes = tm * Dp * itemsize
    vmem_limit = int(min(48 << 20, max(4 << 20, 6 * tile_bytes + (2 << 20))))

    call_kwargs = {}
    if donate_x:
        # x2 is operand index 2 -> alias with output 0 (same shape/dtype).
        call_kwargs["input_output_aliases"] = {2: 0}

    out = pl.pallas_call(
        _affine_kernel,
        out_shape=jax.ShapeDtypeStruct((Mp, Dp), x.dtype),
        grid_spec=pltpu.PrefetchScalarGridSpec(
            num_scalar_prefetch=0,
            grid=(grid_m,),
            in_specs=[
                pl.BlockSpec((1, Dp), lambda i: (0, 0)),   # alpha, resident
                pl.BlockSpec((1, Dp), lambda i: (0, 0)),   # beta, resident
                pl.BlockSpec((tm, Dp), lambda i: (i, 0)),  # x row-tile (streamed)
            ],
            out_specs=pl.BlockSpec((tm, Dp), lambda i: (i, 0)),
        ),
        compiler_params=pltpu.CompilerParams(
            dimension_semantics=("parallel",),
            vmem_limit_bytes=vmem_limit,
        ),
        **call_kwargs,
    )(a2, b2, x2)

    return out.reshape(B, N, D)


if __name__ == "__main__":
    key = jax.random.PRNGKey(0)
    kx, ka, kb, kx2, kx3 = jax.random.split(key, 5)

    # Shapes implied by the module's forward: x is (batch, seq, num_features).
    B, N, D = 2, 8, 32
    x = jax.random.normal(kx, (B, N, D), dtype=jnp.float32)

    # Deterministic parameters (PyTorch init is alpha=ones, beta=zeros;
    # perturb so the affine is non-trivial while staying reproducible).
    alpha = jnp.ones((1, 1, D), dtype=jnp.float32) + 0.1 * jax.random.normal(ka, (1, 1, D))
    beta = jnp.zeros((1, 1, D), dtype=jnp.float32) + 0.1 * jax.random.normal(kb, (1, 1, D))

    # Force the Pallas path even for this tiny test shape.
    y = affine_transform(x, alpha, beta, min_pallas_elements=0)
    y = jax.block_until_ready(y)
    y_ref = alpha * x + beta
    assert y.shape == (B, N, D)
    assert jnp.allclose(y, y_ref, atol=1e-6, rtol=1e-6)

    # Larger shape exercising the lane-dense repack + multi-step grid.
    B2, N2 = 4, 256
    x_big = jax.random.normal(kx2, (B2, N2, D), dtype=jnp.float32)
    y_big = affine_transform(x_big, alpha, beta, min_pallas_elements=0)
    y_big = jax.block_until_ready(y_big)
    y_big_ref = alpha * x_big + beta
    assert y_big.shape == (B2, N2, D)
    assert jnp.allclose(y_big, y_big_ref, atol=1e-6, rtol=1e-6)

    # Ragged shape (Mp not a multiple of tm): exercises Pallas partial-block
    # masking with no jnp.pad / post-slice in the wrapper.
    B3, N3 = 3, 100
    x_rag = jax.random.normal(kx3, (B3, N3, D), dtype=jnp.float32)
    y_rag = affine_transform(x_rag, alpha, beta, min_pallas_elements=0)
    y_rag = jax.block_until_ready(y_rag)
    y_rag_ref = alpha * x_rag + beta
    assert y_rag.shape == (B3, N3, D)
    assert jnp.allclose(y_rag, y_rag_ref, atol=1e-6, rtol=1e-6)

    print("KERNEL_OK")
</pallas_src>

<mosaic_0001>
module attributes {stable_mosaic.version = 11 : i64} {
  func.func @_affine_kernel(%arg0: i32, %arg1: memref<1x128xf32, #tpu.memory_space<vmem>>, %arg2: memref<1x128xf32, #tpu.memory_space<vmem>>, %arg3: memref<4x128xf32, #tpu.memory_space<vmem>>, %arg4: memref<4x128xf32, #tpu.memory_space<vmem>>) attributes {dimension_semantics = [#tpu.dimension_semantics<parallel>], iteration_bounds = array<i64: 1>, scalar_prefetch = 0 : i64, scratch_operands = 0 : i64, tpu.core_type = #tpu.core_type<tc>, window_params = [{pipeline_mode = #tpu.pipeline_mode<synchronous>, transform_indices = @transform_0, window_bounds = array<i64: 1, 128>}, {pipeline_mode = #tpu.pipeline_mode<synchronous>, transform_indices = @transform_1, window_bounds = array<i64: 1, 128>}, {transform_indices = @transform_2, window_bounds = array<i64: 4, 128>}, {transform_indices = @transform_3, window_bounds = array<i64: 4, 128>}]} {
    %c0 = arith.constant 0 : index
    %c0_0 = arith.constant 0 : index
    %0 = vector.load %arg1[%c0, %c0_0] : memref<1x128xf32, #tpu.memory_space<vmem>>, vector<1x128xf32>
    %c0_1 = arith.constant 0 : index
    %c0_2 = arith.constant 0 : index
    %1 = vector.load %arg3[%c0_1, %c0_2] : memref<4x128xf32, #tpu.memory_space<vmem>>, vector<4x128xf32>
    %2 = vector.broadcast %0 : vector<1x128xf32> to vector<4x128xf32>
    %3 = arith.mulf %2, %1 : vector<4x128xf32>
    %c0_3 = arith.constant 0 : index
    %c0_4 = arith.constant 0 : index
    %4 = vector.load %arg2[%c0_3, %c0_4] : memref<1x128xf32, #tpu.memory_space<vmem>>, vector<1x128xf32>
    %5 = vector.broadcast %4 : vector<1x128xf32> to vector<4x128xf32>
    %6 = arith.addf %3, %5 : vector<4x128xf32>
    %c0_5 = arith.constant 0 : index
    %c0_6 = arith.constant 0 : index
    %7 = vector.load %arg4[%c0_5, %c0_6] : memref<4x128xf32, #tpu.memory_space<vmem>>, vector<4x128xf32>
    tpu.vector_store %arg4[%c0_5, %c0_6], %6 {strides = array<i32>} : memref<4x128xf32, #tpu.memory_space<vmem>>, vector<4x128xf32>,
    return
  }
  func.func @transform_0(%arg0: i32) -> (i32, i32) {
    %c0_i32 = arith.constant 0 : i32
    %c0_i32_0 = arith.constant 0 : i32
    %c0_i32_1 = arith.constant 0 : i32
    return %c0_i32, %c0_i32_0 : i32, i32
  }
  func.func @transform_1(%arg0: i32) -> (i32, i32) {
    %c0_i32 = arith.constant 0 : i32
    %c0_i32_0 = arith.constant 0 : i32
    %c0_i32_1 = arith.constant 0 : i32
    return %c0_i32, %c0_i32_0 : i32, i32
  }
  func.func @transform_2(%arg0: i32) -> (i32, i32) {
    %c0_i32 = arith.constant 0 : i32
    %c0_i32_0 = arith.constant 0 : i32
    return %arg0, %c0_i32 : i32, i32
  }
  func.func @transform_3(%arg0: i32) -> (i32, i32) {
    %c0_i32 = arith.constant 0 : i32
    %c0_i32_0 = arith.constant 0 : i32
    return %arg0, %c0_i32 : i32, i32
  }
}

</mosaic_0001>

<bundles_post_ra>
// kernel: tpu_custom_call.1
= control target key start
LH: loop header
LB: loop body
LE: loop exit
PB: predicated region body
PF: predicated region fallthrough
CT: control target
= control target key end

     0   :  { %8 = vsyncpa [#allocation3], 0  ;;  %s179_s0 = inlined_call_operand.hbm [shape: f32[1,128], index: 0, kind: input, shape index: {}]   ;;  %s180_s1 = inlined_call_operand.vmem [shape: f32[1,128], index: 1, kind: input, shape index: {}]   ;;  %s181_s2 = inlined_call_operand.hbm [shape: f32[4,128], index: 2, kind: input, shape index: {}]   ;;  %s182_s3 = inlined_call_operand.hbm [shape: f32[4,128], index: 3, kind: output, shape index: {}]  }
   0x1   :  { %9 = vsyncpa [#allocation6], 0 }
   0x2   :  { %10 = vsyncpa [#allocation4], 0  ;;  %s144_s12 = smov [#allocation2]   ;;  %s145_s14 = smov [#allocation5]  }
   0x3   :  { %s17_s13 = sshll.u32 %s144_s12, 4  ;;  %s29_s15 = sshll.u32 %s145_s14, 4  ;;  %s18_s13 = int_to_ptr.vmem [resolvable:$true] %s17_s13  ;;  %s30_s15 = int_to_ptr.vmem [resolvable:$true] %s29_s15 }
   0x4   :  { %s86_s16 = scalar_lea.vmem %s18_s13, 16  ;;  %s90_s17 = scalar_lea.vmem %s18_s13, 32 }
   0x5   :  { %p87_p0 = scmp.ne.s32.totalorder %s18_s13, %s86_s16  ;;  %p91_p1 = scmp.lt.s32.totalorder %s18_s13, %s18_s13 }
   0x6   :  { %p92_p2 = scmp.lt.s32.totalorder %s90_s17, %s86_s16 }
   0x8   :  { %p93_p3 = por %p92_p2, %p91_p1 }
   0xa   :  { %p94_p4 = pnand %p93_p3, %p87_p0 }
   0xc   :  { %97 = shalt.err (!%p94_p4)
}
   0xd   :  { %20 = dma.hbm_to_vmem [thread:$0]  %s179_s0, 16, %s18_s13, [#allocation3]  }
   0xe   :  { %s106_s20 = scalar_lea.vmem %s30_s15, 64  ;;  %p111_p6 = scmp.lt.s32.totalorder %s30_s15, %s30_s15 }
   0xf   :  { %p107_p5 = scmp.ne.s32.totalorder %s30_s15, %s106_s20  ;;  %p112_p7 = scmp.lt.s32.totalorder %s106_s20, %s106_s20 }
  0x11   :  { %p113_p8 = por %p112_p7, %p111_p6 }
  0x13   :  { %p114_p9 = pnand %p113_p8, %p107_p5 }
  0x15   :  { %117 = shalt.err (!%p114_p9)
}
  0x16   :  { %32 = dma.hbm_to_vmem [thread:$0]  %s181_s2, 64, %s30_s15, [#allocation6]  }
  0x17   :  { %138 = dma.done.wait [#allocation3], 16  }
  0x18   :  { %139 = vsyncadd [#allocation3], 4294967280 }
  0x19   :  { %140 = dma.done.wait [#allocation6], 64  }
  0x1a   :  { %141 = vsyncadd [#allocation6], 4294967232  ;;  %s146_s23 = smov [#allocation7]   ;;  %v73_v0 = vld [vmem:[#allocation2] ss:$0 sm:$0xff] }
  0x1b   :  { %s63_s24 = sshll.u32 %s146_s23, 4  ;;  %v40_v1 = vld [vmem:[#allocation5] sm:$0xf]  ;;  %v74_v2 = vld [vmem:[%s180_s1] ss:$0 sm:$0xff]  ;;  %s64_s24 = int_to_ptr.vmem [resolvable:$true] %s63_s24 }
  0x1c   :  { %v47_v3 = vmul.f32 %v73_v0, %v40_v1  ;;  %s118_s26 = scalar_lea.vmem %s64_s24, 64  ;;  %p123_p11 = scmp.lt.s32.totalorder %s64_s24, %s64_s24 }
  0x1d   :  { %p119_p10 = scmp.ne.s32.totalorder %s64_s24, %s118_s26  ;;  %p124_p12 = scmp.lt.s32.totalorder %s118_s26, %s118_s26 }
  0x1e   :  { %v55_v4 = vadd.f32 %v74_v2, %v47_v3 }
  0x1f   :  { %p125_p13 = por %p124_p12, %p123_p11 }
  0x20   :  { %56 = vst [vmem:[#allocation7] sm:$0xf] %v55_v4 }
  0x21   :  { %p126_p0 = pnand %p125_p13, %p119_p10 }
  0x23   :  { %129 = shalt.err (!%p126_p0)
}
  0x24   :  { %66 = dma.vmem_to_hbm [thread:$0]  %s64_s24, 64, %s182_s3, [#allocation4]  }
  0x25   :  { %142 = dma.done.wait [#allocation4], 64  }
  0x26   :  { %143 = vsyncadd [#allocation4], 4294967232 }
  0x27   :  { %70 = vsyncpa [#allocation3], 1 }
  0x28   :  { %71 = vsyncpa [#allocation6], 1 }
  0x29   :  { %72 = vsyncpa [#allocation4], 1 }

</bundles_post_ra>
